<compile_context>
chip_gen: v7x
topology: tpu7x:2x2x1
jax: 0.10.0
libtpu: 0.0.40
codegen_flags: <defaults>
</compile_context>

<pallas_src>
import jax
import jax.numpy as jnp
from jax.experimental import pallas as pl
from jax.experimental.pallas import tpu as pltpu

_VMEM_LIMIT_BYTES = 48 * 1024 * 1024  # safe on v5e/v6e (128 MiB) and v7x (64 MiB)


def _round_up(x, m):
    return ((x + m - 1) // m) * m


def _pick_tile(dim, candidates):
    for c in candidates:
        if dim % c == 0:
            return c
    return dim


def _xw_kernel(x_ref, w_ref, o_ref):
    # x_ref: (tm1, Fin)   w_ref: (Fin, tn1)   o_ref: (tm1, tn1)
    o_ref[...] = jnp.dot(
        x_ref[...], w_ref[...], preferred_element_type=jnp.float32
    ).astype(o_ref.dtype)


def _aggregate_kernel(a_ref, xw_ref, b_ref, o_ref, acc_ref):
    # a_ref:   (tm, tk)       one (row-tile, contraction-tile) block of A[b]
    # xw_ref:  (tk, tn)       matching rows / Fout-tile of the staged X @ W
    # b_ref:   (1, tn)        bias tile (broadcast over rows)
    # o_ref:   (tm, tn)       output tile (resident across the k axis)
    # acc_ref: (tm, tn) f32   accumulator scratch
    k = pl.program_id(3)

    @pl.when(k == 0)
    def _():
        acc_ref[...] = jnp.zeros_like(acc_ref)

    acc_ref[...] += jnp.dot(
        a_ref[...], xw_ref[...], preferred_element_type=jnp.float32
    )

    @pl.when(k == pl.num_programs(3) - 1)
    def _():
        o_ref[...] = (acc_ref[...] + b_ref[...]).astype(o_ref.dtype)


def graph_conv(X, A, W, bias, *, compute_dtype=None):
    """GraphConv forward.

    X: (B, N, Fin), A: (B, N, N), W: (Fin, Fout), bias: (Fout,).
    compute_dtype: optional (e.g. jnp.bfloat16 on v6e/v7x). Accumulation is
    always f32; output keeps X.dtype.
    """
    B, N, Fin = X.shape
    Fout = W.shape[1]
    out_dtype = X.dtype
    cdt = X.dtype if compute_dtype is None else compute_dtype

    # Lane-dense / MXU-friendly zero-padding (sliced back at the end, so the
    # forward-pass semantics are unchanged: padded rows/cols are zeros).
    Fout_p = _round_up(Fout, 128)
    N_p = _round_up(N, 128)

    Xp = jnp.zeros((B, N_p, Fin), cdt).at[:, :N, :].set(X.astype(cdt))
    Ap = jnp.zeros((B, N_p, N_p), cdt).at[:, :N, :N].set(A.astype(cdt))
    Wp = jnp.zeros((Fin, Fout_p), cdt).at[:, :Fout].set(W.astype(cdt))
    bp = jnp.zeros((1, Fout_p), jnp.float32).at[0, :Fout].set(
        bias.astype(jnp.float32))

    # ---- Stage 1: XW = X @ W, batch folded into one tall M dimension. ----
    M = B * N_p                                   # multiple of 128
    tm1 = _pick_tile(M, (512, 256, 128))
    tn1 = _pick_tile(Fout_p, (512, 256, 128))
    X2 = Xp.reshape(M, Fin)
    # TODO(synk): Fin (contraction) is kept untiled; tile it too if Fin >> 4K.

    xw = pl.pallas_call(
        _xw_kernel,
        out_shape=jax.ShapeDtypeStruct((M, Fout_p), cdt),
        grid_spec=pltpu.PrefetchScalarGridSpec(
            num_scalar_prefetch=0,
            grid=(M // tm1, Fout_p // tn1),
            in_specs=[
                pl.BlockSpec((tm1, Fin), lambda i, j: (i, 0)),
                pl.BlockSpec((Fin, tn1), lambda i, j: (0, j)),
            ],
            out_specs=pl.BlockSpec((tm1, tn1), lambda i, j: (i, j)),
        ),
        compiler_params=pltpu.CompilerParams(
            dimension_semantics=("parallel", "parallel"),
            vmem_limit_bytes=_VMEM_LIMIT_BYTES,
        ),
    )(X2, Wp)
    xw = xw.reshape(B, N_p, Fout_p)

    # ---- Stage 2: out = A @ XW + bias, tiled over rows, Fout, contraction. --
    tm = _pick_tile(N_p, (256, 128))
    tn = _pick_tile(Fout_p, (512, 256, 128))
    tk = _pick_tile(N_p, (512, 256, 128))

    out_p = pl.pallas_call(
        _aggregate_kernel,
        out_shape=jax.ShapeDtypeStruct((B, N_p, Fout_p), out_dtype),
        grid_spec=pltpu.PrefetchScalarGridSpec(
            num_scalar_prefetch=0,
            grid=(B, N_p // tm, Fout_p // tn, N_p // tk),
            in_specs=[
                pl.BlockSpec((pl.Squeezed(), tm, tk),
                             lambda b, i, j, k: (b, i, k)),
                pl.BlockSpec((pl.Squeezed(), tk, tn),
                             lambda b, i, j, k: (b, k, j)),
                pl.BlockSpec((1, tn), lambda b, i, j, k: (0, j)),
            ],
            out_specs=pl.BlockSpec((pl.Squeezed(), tm, tn),
                                   lambda b, i, j, k: (b, i, j)),
            scratch_shapes=[pltpu.VMEM((tm, tn), jnp.float32)],
        ),
        compiler_params=pltpu.CompilerParams(
            dimension_semantics=("parallel", "parallel", "parallel",
                                 "arbitrary"),
            vmem_limit_bytes=_VMEM_LIMIT_BYTES,
        ),
    )(Ap, xw, bp)

    return out_p[:, :N, :Fout]


if __name__ == "__main__":
    # Small, deterministic shapes: batch=2, nodes=16, input_size=32, output_size=32
    B, N, Fin, Fout = 2, 16, 32, 32

    key = jax.random.PRNGKey(0)
    kx, ka, kw, kb = jax.random.split(key, 4)

    X = jax.random.normal(kx, (B, N, Fin), dtype=jnp.float32)
    A = jax.random.normal(ka, (B, N, N), dtype=jnp.float32)
    # Deterministic parameter init (the module __init__ leaves the params
    # uninitialized; we use a fixed normal draw instead).
    W = jax.random.normal(kw, (Fin, Fout), dtype=jnp.float32) * 0.1
    bias = jax.random.normal(kb, (Fout,), dtype=jnp.float32) * 0.1

    out = jax.block_until_ready(graph_conv(X, A, W, bias))

    # Reference check in plain JAX.
    ref = jnp.einsum("bnm,bmf->bnf", A, X @ W) + bias
    assert out.shape == (B, N, Fout)
    assert out.dtype == X.dtype
    assert jnp.allclose(out, ref, atol=1e-4, rtol=1e-4)

    # bf16 compute path (f32 accumulation) recommended for v6e/v7x MXUs.
    out_bf16 = jax.block_until_ready(
        graph_conv(X, A, W, bias, compute_dtype=jnp.bfloat16))
    assert out_bf16.shape == (B, N, Fout)
    assert jnp.allclose(out_bf16, ref, atol=0.5, rtol=0.05)

    print("KERNEL_OK")
</pallas_src>

<mosaic_0001>
module attributes {stable_mosaic.version = 11 : i64} {
  func.func @_xw_kernel(%arg0: i32, %arg1: i32, %arg2: memref<256x32xf32, #tpu.memory_space<vmem>>, %arg3: memref<32x128xf32, #tpu.memory_space<vmem>>, %arg4: memref<256x128xf32, #tpu.memory_space<vmem>>) attributes {dimension_semantics = [#tpu.dimension_semantics<parallel>, #tpu.dimension_semantics<parallel>], iteration_bounds = array<i64: 1, 1>, scalar_prefetch = 0 : i64, scratch_operands = 0 : i64, tpu.core_type = #tpu.core_type<tc>, window_params = [{transform_indices = @transform_0, window_bounds = array<i64: 256, 32>}, {transform_indices = @transform_1, window_bounds = array<i64: 32, 128>}, {transform_indices = @transform_2, window_bounds = array<i64: 256, 128>}]} {
    %c0 = arith.constant 0 : index
    %c0_0 = arith.constant 0 : index
    %0 = vector.load %arg2[%c0, %c0_0] : memref<256x32xf32, #tpu.memory_space<vmem>>, vector<256x32xf32>
    %c0_1 = arith.constant 0 : index
    %c0_2 = arith.constant 0 : index
    %1 = vector.load %arg3[%c0_1, %c0_2] : memref<32x128xf32, #tpu.memory_space<vmem>>, vector<32x128xf32>
    %cst = arith.constant dense<0.000000e+00> : vector<256x128xf32>
    %2 = tpu.matmul %0, %1, %cst {dimension_numbers = #tpu.dot_dimension_numbers<[1], [0], [0], [1], [0, 0, 1, 1], [], []>} : vector<256x32xf32>, vector<32x128xf32>, vector<256x128xf32> -> vector<256x128xf32>
    %c0_3 = arith.constant 0 : index
    %c0_4 = arith.constant 0 : index
    %3 = vector.load %arg4[%c0_3, %c0_4] : memref<256x128xf32, #tpu.memory_space<vmem>>, vector<256x128xf32>
    tpu.vector_store %arg4[%c0_3, %c0_4], %2 {strides = array<i32>} : memref<256x128xf32, #tpu.memory_space<vmem>>, vector<256x128xf32>,
    return
  }
  func.func @transform_0(%arg0: i32, %arg1: i32) -> (i32, i32) {
    %c0_i32 = arith.constant 0 : i32
    %c0_i32_0 = arith.constant 0 : i32
    return %arg0, %c0_i32 : i32, i32
  }
  func.func @transform_1(%arg0: i32, %arg1: i32) -> (i32, i32) {
    %c0_i32 = arith.constant 0 : i32
    %c0_i32_0 = arith.constant 0 : i32
    return %c0_i32, %arg1 : i32, i32
  }
  func.func @transform_2(%arg0: i32, %arg1: i32) -> (i32, i32) {
    %c0_i32 = arith.constant 0 : i32
    return %arg0, %arg1 : i32, i32
  }
}

</mosaic_0001>

<bundles_post_ra>
// kernel: tpu_custom_call.1
= control target key start
LH: loop header
LB: loop body
LE: loop exit
PB: predicated region body
PF: predicated region fallthrough
CT: control target
= control target key end

     0   :  { %vm48_vm0 = vcmask 261120   ;;  %s751_s0 = inlined_call_operand.vmem [shape: f32[256,32], index: 0, kind: input, shape index: {}]   ;;  %s752_s1 = inlined_call_operand.vmem [shape: f32[32,128], index: 1, kind: input, shape index: {}]   ;;  %s753_s2 = inlined_call_operand.hbm [shape: f32[256,128], index: 2, kind: output, shape index: {}]  }
   0x1   :  { %v44_v0 = vld [vmem:[%s752_s1] sm:$0xff]  ;;  %v45_v1 = vld [vmem:[%s752_s1 + $0x8] sm:$0xff]  ;;  %v46_v2 = vld [vmem:[%s752_s1 + $0x10] sm:$0xff] }
   0x2   :  { %v542_v3 = vpack.c.bf16 %v45_v1, %v44_v0  ;;  %v47_v4 = vld [vmem:[%s752_s1 + $0x18] sm:$0xff]  ;;  %v12_v5 = vld [vmem:[%s751_s0] sm:$0xff]  ;;  %v13_v8 = vld [vmem:[%s751_s0 + $0x8] sm:$0xff] }
   0x3   :  { %v28_v6 = vld [vmem:[%s751_s0 + $0x80] sm:$0xff]  ;;  %v546_v7 = vpack.c.bf16 %v47_v4, %v46_v2  ;;  %494 = vmatprep.mubr.msk.f32.mxu0 %vm48_vm0, %v12_v5  ;;  %v29_v9 = vld [vmem:[%s751_s0 + $0x88] sm:$0xff]  ;;  %v14_v10 = vld [vmem:[%s751_s0 + $0x10] sm:$0xff] }
   0x4   :  { %518 = vmatprep.mubr.msk.f32.mxu1 %vm48_vm0, %v28_v6  ;;  %543 = vmatprep.subr.bf16.mxu0 %v542_v3  ;;  %v30_v11 = vld [vmem:[%s751_s0 + $0x90] sm:$0xff]  ;;  %v15_v12 = vld [vmem:[%s751_s0 + $0x18] sm:$0xff] }
   0x5   :  { %550 = vmatprep.subr.bf16.mxu1 %v542_v3  ;;  %545 = vmatpush3.bf16.msra.mxu0 %v542_v3  ;;  %v31_v13 = vld [vmem:[%s751_s0 + $0x98] sm:$0xff] }
   0x6   :  { %552 = vmatpush3.bf16.msra.mxu1 %v542_v3  ;;  %547 = vmatprep.subr.bf16.mxu0 %v546_v7 }
   0x7   :  { %551 = vmatprep.subr.bf16.mxu1 %v546_v7 }
   0x9   :  { %549 = vmatpush3.bf16.msra.mxu0 %v546_v7 }
   0xa   :  { %553 = vmatpush3.bf16.msra.mxu1 %v546_v7 }
   0xc   :  { %495 = vmatmul.mubr.msk.f32.vlgmr.msra.gmra.mrb[0].mxu0 %vm48_vm0, %v13_v8 }
   0xd   :  { %519 = vmatmul.mubr.msk.f32.vlgmr.msra.gmra.mrb[0].mxu1 %vm48_vm0, %v29_v9  ;;  %497 = vmatprep.mubr.msk.f32.mxu0 %vm48_vm0, %v14_v10 }
   0xe   :  { %521 = vmatprep.mubr.msk.f32.mxu1 %vm48_vm0, %v30_v11 }
   0xf   :  { %7 = vsyncpa [#allocation3], 0  ;;  %v16_v14 = vld [vmem:[%s751_s0 + $0x20] sm:$0xff]  ;;  %v17_v16 = vld [vmem:[%s751_s0 + $0x28] sm:$0xff] }
  0x10   :  { %v32_v15 = vld [vmem:[%s751_s0 + $0xa0] sm:$0xff]  ;;  %498 = vmatmul.mubr.msk.f32.gmra.mrb[2].mxu0 %vm48_vm0, %v15_v12  ;;  %v33_v17 = vld [vmem:[%s751_s0 + $0xa8] sm:$0xff]  ;;  %v18_v18 = vld [vmem:[%s751_s0 + $0x30] sm:$0xff] }
  0x11   :  { %522 = vmatmul.mubr.msk.f32.gmra.mrb[2].mxu1 %vm48_vm0, %v31_v13  ;;  %500 = vmatprep.mubr.msk.f32.mxu0 %vm48_vm0, %v16_v14  ;;  %v34_v19 = vld [vmem:[%s751_s0 + $0xb0] sm:$0xff]  ;;  %v19_v20 = vld [vmem:[%s751_s0 + $0x38] sm:$0xff]  ;;  %v20_v22 = vld [vmem:[%s751_s0 + $0x40] sm:$0xff] }
  0x12   :  { %524 = vmatprep.mubr.msk.f32.mxu1 %vm48_vm0, %v32_v15  ;;  %v35_v21 = vld [vmem:[%s751_s0 + $0xb8] sm:$0xff]  ;;  %v36_v23 = vld [vmem:[%s751_s0 + $0xc0] sm:$0xff]  ;;  %v21_v24 = vld [vmem:[%s751_s0 + $0x48] sm:$0xff] }
  0x13   :  { %v37_v25 = vld [vmem:[%s751_s0 + $0xc8] sm:$0xff]  ;;  %v22_v26 = vld [vmem:[%s751_s0 + $0x50] sm:$0xff]  ;;  %v23_v28 = vld [vmem:[%s751_s0 + $0x58] sm:$0xff] }
  0x14   :  { %501 = vmatmul.mubr.msk.f32.gmra.mrb[4].mxu0 %vm48_vm0, %v17_v16  ;;  %v38_v27 = vld [vmem:[%s751_s0 + $0xd0] sm:$0xff]  ;;  %v39_v29 = vld [vmem:[%s751_s0 + $0xd8] sm:$0xff]  ;;  %v24_v30 = vld [vmem:[%s751_s0 + $0x60] sm:$0xff] }
  0x15   :  { %525 = vmatmul.mubr.msk.f32.gmra.mrb[4].mxu1 %vm48_vm0, %v33_v17  ;;  %503 = vmatprep.mubr.msk.f32.mxu0 %vm48_vm0, %v18_v18  ;;  %v40_v31 = vld [vmem:[%s751_s0 + $0xe0] sm:$0xff]  ;;  %v25_v32 = vld [vmem:[%s751_s0 + $0x68] sm:$0xff]  ;;  %v26_v34 = vld [vmem:[%s751_s0 + $0x70] sm:$0xff] }
  0x16   :  { %527 = vmatprep.mubr.msk.f32.mxu1 %vm48_vm0, %v34_v19  ;;  %v41_v33 = vld [vmem:[%s751_s0 + $0xe8] sm:$0xff]  ;;  %v42_v35 = vld [vmem:[%s751_s0 + $0xf0] sm:$0xff]  ;;  %v27_v36 = vld [vmem:[%s751_s0 + $0x78] sm:$0xff] }
  0x17   :  { %v43_v37 = vld [vmem:[%s751_s0 + $0xf8] sm:$0xff]  ;;  %s581_s0 = smov [#allocation2]  }
  0x18   :  { %504 = vmatmul.mubr.msk.f32.gmra.mrb[6].mxu0 %vm48_vm0, %v19_v20  ;;  %s407_s22 = sshll.u32 %s581_s0, 4  ;;  %s408_s22 = int_to_ptr.vmem [resolvable:$true] %s407_s22 }
  0x19   :  { %528 = vmatmul.mubr.msk.f32.gmra.mrb[6].mxu1 %vm48_vm0, %v35_v21  ;;  %506 = vmatprep.mubr.msk.f32.mxu0 %vm48_vm0, %v20_v22  ;;  %s557_s23 = scalar_lea.vmem %s408_s22, 4096  ;;  %p562_p1 = scmp.lt.s32.totalorder %s408_s22, %s408_s22 }
  0x1a   :  { %530 = vmatprep.mubr.msk.f32.mxu1 %vm48_vm0, %v36_v23  ;;  %p558_p0 = scmp.ne.s32.totalorder %s408_s22, %s557_s23  ;;  %p563_p2 = scmp.lt.s32.totalorder %s557_s23, %s557_s23 }
  0x1c   :  { %507 = vmatmul.mubr.msk.f32.gmra.mrb[8].mxu0 %vm48_vm0, %v21_v24  ;;  %p564_p3 = por %p563_p2, %p562_p1 }
  0x1d   :  { %531 = vmatmul.mubr.msk.f32.gmra.mrb[8].mxu1 %vm48_vm0, %v37_v25  ;;  %509 = vmatprep.mubr.msk.f32.mxu0 %vm48_vm0, %v22_v26 }
  0x1e   :  { %533 = vmatprep.mubr.msk.f32.mxu1 %vm48_vm0, %v38_v27  ;;  %p565_p4 = pnand %p564_p3, %p558_p0 }
  0x20   :  { %510 = vmatmul.mubr.msk.f32.gmra.mrb[10].mxu0 %vm48_vm0, %v23_v28 }
  0x21   :  { %534 = vmatmul.mubr.msk.f32.gmra.mrb[10].mxu1 %vm48_vm0, %v39_v29  ;;  %512 = vmatprep.mubr.msk.f32.mxu0 %vm48_vm0, %v24_v30 }
  0x22   :  { %536 = vmatprep.mubr.msk.f32.mxu1 %vm48_vm0, %v40_v31 }
  0x24   :  { %513 = vmatmul.mubr.msk.f32.gmra.mrb[12].mxu0 %vm48_vm0, %v25_v32 }
  0x25   :  { %537 = vmatmul.mubr.msk.f32.gmra.mrb[12].mxu1 %vm48_vm0, %v41_v33  ;;  %515 = vmatprep.mubr.msk.f32.mxu0 %vm48_vm0, %v26_v34 }
  0x26   :  { %539 = vmatprep.mubr.msk.f32.mxu1 %vm48_vm0, %v42_v35 }
  0x28   :  { %516 = vmatmul.mubr.msk.f32.gmra.mrb[14].mxu0 %vm48_vm0, %v27_v36 }
  0x29   :  { %540 = vmatmul.mubr.msk.f32.gmra.mrb[14].mxu1 %vm48_vm0, %v43_v37 }
  0xdf   :  { %v496_v38 = vpop.f32.mrb[0].mxu0 }
  0xe0   :  { %v520_v39 = vpop.f32.mrb[0].mxu1  ;;  %371 = vst [vmem:[#allocation2 + $0x8] sm:$0xff] %v496_v38  ;;  %v211_v40 = vpop.f32.mrb[1].mxu0 }
  0xe1   :  { %387 = vst [vmem:[#allocation2 + $0x88] sm:$0xff] %v520_v39  ;;  %v291_v41 = vpop.f32.mrb[1].mxu1  ;;  %370 = vst [vmem:[#allocation2] sm:$0xff] %v211_v40 }
  0xe2   :  { %386 = vst [vmem:[#allocation2 + $0x80] sm:$0xff] %v291_v41 }
  0xe3   :  { %v499_v42 = vpop.f32.mrb[2].mxu0 }
  0xe4   :  { %v523_v43 = vpop.f32.mrb[2].mxu1  ;;  %373 = vst [vmem:[#allocation2 + $0x18] sm:$0xff] %v499_v42  ;;  %v221_v44 = vpop.f32.mrb[3].mxu0 }
  0xe5   :  { %389 = vst [vmem:[#allocation2 + $0x98] sm:$0xff] %v523_v43  ;;  %v301_v45 = vpop.f32.mrb[3].mxu1  ;;  %372 = vst [vmem:[#allocation2 + $0x10] sm:$0xff] %v221_v44 }
  0xe6   :  { %388 = vst [vmem:[#allocation2 + $0x90] sm:$0xff] %v301_v45 }
  0xe7   :  { %v502_v46 = vpop.f32.mrb[4].mxu0 }
  0xe8   :  { %v526_v47 = vpop.f32.mrb[4].mxu1  ;;  %375 = vst [vmem:[#allocation2 + $0x28] sm:$0xff] %v502_v46  ;;  %v231_v48 = vpop.f32.mrb[5].mxu0 }
  0xe9   :  { %391 = vst [vmem:[#allocation2 + $0xa8] sm:$0xff] %v526_v47  ;;  %v311_v49 = vpop.f32.mrb[5].mxu1  ;;  %374 = vst [vmem:[#allocation2 + $0x20] sm:$0xff] %v231_v48 }
  0xea   :  { %390 = vst [vmem:[#allocation2 + $0xa0] sm:$0xff] %v311_v49 }
  0xeb   :  { %v505_v50 = vpop.f32.mrb[6].mxu0 }
  0xec   :  { %v529_v51 = vpop.f32.mrb[6].mxu1  ;;  %377 = vst [vmem:[#allocation2 + $0x38] sm:$0xff] %v505_v50  ;;  %v241_v52 = vpop.f32.mrb[7].mxu0 }
  0xed   :  { %393 = vst [vmem:[#allocation2 + $0xb8] sm:$0xff] %v529_v51  ;;  %v321_v53 = vpop.f32.mrb[7].mxu1  ;;  %376 = vst [vmem:[#allocation2 + $0x30] sm:$0xff] %v241_v52 }
  0xee   :  { %392 = vst [vmem:[#allocation2 + $0xb0] sm:$0xff] %v321_v53 }
  0xef   :  { %v508_v54 = vpop.f32.mrb[8].mxu0 }
  0xf0   :  { %v532_v55 = vpop.f32.mrb[8].mxu1  ;;  %379 = vst [vmem:[#allocation2 + $0x48] sm:$0xff] %v508_v54  ;;  %v251_v56 = vpop.f32.mrb[9].mxu0 }
  0xf1   :  { %395 = vst [vmem:[#allocation2 + $0xc8] sm:$0xff] %v532_v55  ;;  %v331_v57 = vpop.f32.mrb[9].mxu1  ;;  %378 = vst [vmem:[#allocation2 + $0x40] sm:$0xff] %v251_v56 }
  0xf2   :  { %394 = vst [vmem:[#allocation2 + $0xc0] sm:$0xff] %v331_v57 }
  0xf3   :  { %v511_v58 = vpop.f32.mrb[10].mxu0 }
  0xf4   :  { %v535_v59 = vpop.f32.mrb[10].mxu1  ;;  %381 = vst [vmem:[#allocation2 + $0x58] sm:$0xff] %v511_v58  ;;  %v261_v60 = vpop.f32.mrb[11].mxu0 }
  0xf5   :  { %397 = vst [vmem:[#allocation2 + $0xd8] sm:$0xff] %v535_v59  ;;  %v341_v61 = vpop.f32.mrb[11].mxu1  ;;  %380 = vst [vmem:[#allocation2 + $0x50] sm:$0xff] %v261_v60 }
  0xf6   :  { %396 = vst [vmem:[#allocation2 + $0xd0] sm:$0xff] %v341_v61 }
  0xf7   :  { %v514_v62 = vpop.f32.mrb[12].mxu0 }
  0xf8   :  { %v538_v63 = vpop.f32.mrb[12].mxu1  ;;  %383 = vst [vmem:[#allocation2 + $0x68] sm:$0xff] %v514_v62  ;;  %v271_v0 = vpop.f32.mrb[13].mxu0 }
  0xf9   :  { %399 = vst [vmem:[#allocation2 + $0xe8] sm:$0xff] %v538_v63  ;;  %v351_v1 = vpop.f32.mrb[13].mxu1  ;;  %382 = vst [vmem:[#allocation2 + $0x60] sm:$0xff] %v271_v0 }
  0xfa   :  { %398 = vst [vmem:[#allocation2 + $0xe0] sm:$0xff] %v351_v1 }
  0xfb   :  { %v517_v2 = vpop.f32.mrb[14].mxu0 }
  0xfc   :  { %v541_v3 = vpop.f32.mrb[14].mxu1  ;;  %385 = vst [vmem:[#allocation2 + $0x78] sm:$0xff] %v517_v2  ;;  %v281_v4 = vpop.f32.mrb[15].mxu0 }
  0xfd   :  { %401 = vst [vmem:[#allocation2 + $0xf8] sm:$0xff] %v541_v3  ;;  %v361_v5 = vpop.f32.mrb[15].mxu1  ;;  %384 = vst [vmem:[#allocation2 + $0x70] sm:$0xff] %v281_v4 }
  0xfe   :  { %400 = vst [vmem:[#allocation2 + $0xf0] sm:$0xff] %v361_v5 }
  0xff   :  { %568 = shalt.err (!%p565_p4)
}
 0x100   :  { %s569_s26 = scalar_lea.hbm %s753_s2, 4096 }
 0x101   :  { %p570_p5 = scmp.ne.s32.totalorder %s753_s2, %s569_s26  ;;  %p573_p6 = scmp.lt.u32.totalorder %s569_s26, %s753_s2 }
 0x103   :  { %p575_p7 = pnand %p573_p6, %p570_p5 }
 0x105   :  { %578 = shalt.err (!%p575_p7)
}
 0x106   :  { %s582_s3 = smov 128   ;;  %s583_s4 = smov 8  }
 0x107   :  { %413 = dma.vmem_to_hbm [thread:$0]  %s408_s22, 4096, %s753_s2, [#allocation3], %s582_s3, %s582_s3, %s583_s4  }
 0x108   :  { %579 = dma.done.wait [#allocation3], 4096  }
 0x109   :  { %580 = vsyncadd [#allocation3], 4294963200 }
 0x10a   :  { %417 = vsyncpa [#allocation3], 1 }

</bundles_post_ra>
